<compile_context>
chip_gen: v5e
topology: v5e:2x2
jax: 0.10.0
libtpu: 0.0.40
codegen_flags: <defaults>
</compile_context>

<pallas_src>
import jax
import jax.numpy as jnp
import numpy as np
from jax.experimental import pallas as pl
from jax.experimental.pallas import tpu as pltpu


def _make_kernel(bf16_operands):
    def kernel(x_ref, w_ref, b_ref, o_ref):
        # x_ref: (b_tile, in_g)   w_ref: (1, in_g, out_tile)
        # b_ref: (1, 1, out_tile) o_ref: (b_tile, out_tile)
        x = x_ref[...]
        if bf16_operands:
            x = x.astype(jnp.bfloat16)  # in-kernel cast: avoids an extra XLA pass over x
        acc = jnp.dot(x, w_ref[0], preferred_element_type=jnp.float32)  # MXU, f32 accum
        o_ref[...] = (acc + b_ref[0]).astype(o_ref.dtype)               # bias add in f32
    return kernel


def _vmem_budget():
    """(tile-picking budget, vmem_limit_bytes) derived from this generation's VMEM."""
    try:
        cap = int(pltpu.get_tpu_info().vmem_capacity_bytes)
    except Exception:
        cap = 64 << 20                       # conservative: v7x per-core physical VMEM
    budget = min(cap // 4, 32 << 20)         # v5e/v6e: 32 MiB, v7x: 16 MiB
    vmem_limit = min(cap // 2, 64 << 20)     # headroom for compiler temps
    return budget, vmem_limit


def _out_tile_candidates(out_g, dim_out):
    """Descending lane-dense tilings of out_g (full group width first)."""
    cands = []
    if out_g % 128 == 0 or out_g == dim_out:
        cands.append(out_g)
    if out_g % 128 == 0:
        for t in (512, 384, 256, 128):
            if t < out_g and out_g % t == 0:
                cands.append(t)
    return cands


def _select_tiles(B, in_g, out_g, dim_out, x_item, w_item, bf16_ops, sub_mult, budget):
    """Pick (b_tile, out_tile) whose double-buffered working set fits `budget`.
    Returns (None, None) if nothing fits -> caller uses the XLA fallback."""
    for out_tile in _out_tile_candidates(out_g, dim_out):
        fixed = 2 * in_g * out_tile * w_item + 2 * out_tile * 4        # weight + bias (x2 buf)
        per_row = (2 * in_g * x_item                                   # x tile (x2 buf)
                   + 2 * out_tile * x_item                             # out tile (x2 buf)
                   + out_tile * 4                                      # f32 matmul/epilogue temp
                   + (in_g * 2 if bf16_ops else 0))                    # in-kernel bf16 copy of x
        if fixed + sub_mult * per_row > budget:
            continue                                                   # weight block too big

        def fits(bt, fixed=fixed, per_row=per_row):
            return fixed + bt * per_row <= budget

        if fits(B):                                                    # whole batch in one tile
            return B, out_tile
        v = (min(B, 4096) // sub_mult) * sub_mult
        while v >= sub_mult:
            if B % v == 0 and fits(v):
                return v, out_tile
            v -= sub_mult
    return None, None


def grouped_linear(x, weight, bias, n_groups, *, bf16_operands=False,
                   min_rows_for_pallas=256, min_flops_for_pallas=4e6):
    """x: (B, dim_in); weight: (dim_out, dim_in//G, 1); bias: (dim_out,).
    Returns (B, dim_out, 1) exactly like the PyTorch module.
    bf16_operands=True uses bf16 MXU inputs with f32 accumulation (faster, opt-in)."""
    B, dim_in = x.shape
    dim_out = weight.shape[0]
    assert dim_in % n_groups == 0 and dim_out % n_groups == 0
    in_g = dim_in // n_groups
    out_g = dim_out // n_groups

    # Tiny weight-side repack only; activations stay flat (no transpose pass over x/out).
    wg = weight[..., 0].reshape(n_groups, out_g, in_g).transpose(0, 2, 1)  # (G, in_g, out_g)
    bg = bias.reshape(n_groups, 1, out_g).astype(jnp.float32)              # (G, 1, out_g)
    if bf16_operands:
        wg = wg.astype(jnp.bfloat16)

    def xla_fallback():
        xg = x.reshape(B, n_groups, in_g)
        out = jnp.einsum('bgi,gio->bgo', xg.astype(wg.dtype), wg,
                         preferred_element_type=jnp.float32)
        out = out + bg.reshape(1, n_groups, out_g)
        return out.reshape(B, dim_out).astype(x.dtype)[..., None]

    flops = 2.0 * B * in_g * out_g * n_groups
    budget, vmem_limit = _vmem_budget()
    sub_mult = 8 if x.dtype.itemsize == 4 else (16 if x.dtype.itemsize == 2 else 32)

    lane_in_ok = (in_g % 128 == 0) or (in_g == dim_in)        # x block last dim rule
    big_enough = (B >= min_rows_for_pallas) and (flops >= min_flops_for_pallas)

    b_tile = out_tile = None
    if lane_in_ok and big_enough:
        b_tile, out_tile = _select_tiles(B, in_g, out_g, dim_out, x.dtype.itemsize,
                                         wg.dtype.itemsize, bf16_operands, sub_mult, budget)

    if b_tile is None:
        # Too small / odd-shaped / doesn't fit VMEM: single fused XLA einsum.
        return xla_fallback()

    n_tiles = out_g // out_tile
    n_b = B // b_tile
    # v7x megacore balance: avoid an odd number of (few) parallel steps.
    total = n_groups * n_tiles * n_b
    if total % 2 == 1 and total <= 32 and b_tile % (2 * sub_mult) == 0:
        b_tile //= 2
        n_b *= 2

    grid = (n_groups, n_tiles, n_b)  # B innermost -> per-(group, n-tile) weight stays resident

    cost = pl.CostEstimate(
        flops=int(flops),
        transcendentals=0,
        bytes_accessed=int(x.size * x.dtype.itemsize * n_tiles
                           + wg.size * wg.dtype.itemsize
                           + bg.size * bg.dtype.itemsize
                           + B * dim_out * x.dtype.itemsize),
    )

    out = pl.pallas_call(
        _make_kernel(bf16_operands),
        out_shape=jax.ShapeDtypeStruct((B, dim_out), x.dtype),
        grid=grid,
        in_specs=[
            # activations sliced straight out of flat (B, dim_in): no host transpose
            pl.BlockSpec((b_tile, in_g), lambda g, n, b: (b, g)),
            # per-(group, n-tile) weight; index ignores b -> VMEM resident across B tiles
            pl.BlockSpec((1, in_g, out_tile), lambda g, n, b: (g, 0, n)),
            # per-(group, n-tile) bias; re-DMA'd only when (g, n) changes
            pl.BlockSpec((1, 1, out_tile), lambda g, n, b: (g, 0, n)),
        ],
        # lane-dense output tile (out_tile multiple of 128, or the full last dim)
        out_specs=pl.BlockSpec((b_tile, out_tile),
                               lambda g, n, b, nt=n_tiles: (b, g * nt + n)),
        compiler_params=pltpu.CompilerParams(
            dimension_semantics=("parallel", "parallel", "parallel"),
            vmem_limit_bytes=vmem_limit,
        ),
        cost_estimate=cost,
    )(x, wg, bg)

    return out[..., None]


def _reference(x, weight, bias, n_groups):
    """Pure-JAX reference of the grouped 1x1 conv."""
    B, dim_in = x.shape
    dim_out = weight.shape[0]
    in_g = dim_in // n_groups
    out_g = dim_out // n_groups
    outs = []
    for g in range(n_groups):
        xg = x[:, g * in_g:(g + 1) * in_g]                 # (B, in_g)
        wgm = weight[g * out_g:(g + 1) * out_g, :, 0]      # (out_g, in_g)
        bgv = bias[g * out_g:(g + 1) * out_g]              # (out_g,)
        outs.append(xg @ wgm.T + bgv)
    return jnp.concatenate(outs, axis=-1)[..., None]       # (B, dim_out, 1)


if __name__ == "__main__":
    key = jax.random.PRNGKey(0)

    def make_inputs(k, B, dim_in, dim_out, n_groups):
        kx, kw, kb = jax.random.split(k, 3)
        in_g = dim_in // n_groups
        bound = 1.0 / np.sqrt(in_g)  # Conv1d default init range (fan_in = in_g * k = in_g)
        x = jax.random.normal(kx, (B, dim_in), dtype=jnp.float32)
        w = jax.random.uniform(kw, (dim_out, in_g, 1), dtype=jnp.float32,
                               minval=-bound, maxval=bound)
        b = jax.random.uniform(kb, (dim_out,), dtype=jnp.float32,
                               minval=-bound, maxval=bound)
        return x, w, b

    k1, k2 = jax.random.split(key)

    # 1) Pallas path (fp32 operands): lane-dense groups, B large enough for the kernel.
    B, dim_in, dim_out, G = 512, 256, 512, 2
    x, w, b = make_inputs(k1, B, dim_in, dim_out, G)
    out = jax.block_until_ready(grouped_linear(x, w, b, G))
    ref = _reference(x, w, b, G)
    assert out.shape == (B, dim_out, 1)
    np.testing.assert_allclose(np.asarray(out), np.asarray(ref), rtol=1e-5, atol=1e-5)

    # 2) Same shape with bf16 MXU operands / f32 accumulation (opt-in, looser tolerance).
    out_bf16 = jax.block_until_ready(grouped_linear(x, w, b, G, bf16_operands=True))
    np.testing.assert_allclose(np.asarray(out_bf16), np.asarray(ref), rtol=2e-2, atol=3e-2)

    # 3) Small / odd-shaped problem: exercises the XLA einsum fallback path.
    Bs, dis, dos, Gs = 16, 8, 12, 2
    xs, ws, bs = make_inputs(k2, Bs, dis, dos, Gs)
    outs = jax.block_until_ready(grouped_linear(xs, ws, bs, Gs))
    refs = _reference(xs, ws, bs, Gs)
    assert outs.shape == (Bs, dos, 1)
    np.testing.assert_allclose(np.asarray(outs), np.asarray(refs), rtol=1e-5, atol=1e-5)

    print("KERNEL_OK")
</pallas_src>

<mosaic_0001>
module attributes {stable_mosaic.version = 11 : i64} {
  func.func @kernel(%arg0: i32, %arg1: i32, %arg2: i32, %arg3: memref<512x128xf32, #tpu.memory_space<vmem>>, %arg4: memref<1x128x256xf32, #tpu.memory_space<vmem>>, %arg5: memref<1x1x256xf32, #tpu.memory_space<vmem>>, %arg6: memref<512x256xf32, #tpu.memory_space<vmem>>) attributes {dimension_semantics = [#tpu.dimension_semantics<parallel>, #tpu.dimension_semantics<parallel>, #tpu.dimension_semantics<parallel>], iteration_bounds = array<i64: 2, 1, 1>, scalar_prefetch = 0 : i64, scratch_operands = 0 : i64, tpu.core_type = #tpu.core_type<tc>, window_params = [{transform_indices = @transform_0, window_bounds = array<i64: 512, 128>}, {transform_indices = @transform_1, window_bounds = array<i64: 1, 128, 256>}, {transform_indices = @transform_2, window_bounds = array<i64: 1, 1, 256>}, {transform_indices = @transform_3, window_bounds = array<i64: 512, 256>}]} {
    %c0 = arith.constant 0 : index
    %c0_0 = arith.constant 0 : index
    %0 = vector.load %arg3[%c0, %c0_0] : memref<512x128xf32, #tpu.memory_space<vmem>>, vector<512x128xf32>
    %c0_1 = arith.constant 0 : index
    %c0_2 = arith.constant 0 : index
    %c0_3 = arith.constant 0 : index
    %1 = vector.load %arg4[%c0_1, %c0_2, %c0_3] : memref<1x128x256xf32, #tpu.memory_space<vmem>>, vector<1x128x256xf32>
    %2 = vector.shape_cast %1 : vector<1x128x256xf32> to vector<128x256xf32>
    %cst = arith.constant dense<0.000000e+00> : vector<512x256xf32>
    %3 = tpu.matmul %0, %2, %cst {dimension_numbers = #tpu.dot_dimension_numbers<[1], [0], [0], [1], [0, 0, 1, 1], [], []>} : vector<512x128xf32>, vector<128x256xf32>, vector<512x256xf32> -> vector<512x256xf32>
    %c0_4 = arith.constant 0 : index
    %c0_5 = arith.constant 0 : index
    %c0_6 = arith.constant 0 : index
    %4 = vector.load %arg5[%c0_4, %c0_5, %c0_6] : memref<1x1x256xf32, #tpu.memory_space<vmem>>, vector<1x1x256xf32>
    %5 = vector.shape_cast %4 : vector<1x1x256xf32> to vector<1x256xf32>
    %6 = vector.broadcast %5 : vector<1x256xf32> to vector<512x256xf32>
    %7 = arith.addf %3, %6 : vector<512x256xf32>
    %c0_7 = arith.constant 0 : index
    %c0_8 = arith.constant 0 : index
    %8 = vector.load %arg6[%c0_7, %c0_8] : memref<512x256xf32, #tpu.memory_space<vmem>>, vector<512x256xf32>
    tpu.vector_store %arg6[%c0_7, %c0_8], %7 {strides = array<i32>} : memref<512x256xf32, #tpu.memory_space<vmem>>, vector<512x256xf32>,
    return
  }
  func.func @transform_0(%arg0: i32, %arg1: i32, %arg2: i32) -> (i32, i32) {
    %c0_i32 = arith.constant 0 : i32
    return %arg2, %arg0 : i32, i32
  }
  func.func @transform_1(%arg0: i32, %arg1: i32, %arg2: i32) -> (i32, i32, i32) {
    %c0_i32 = arith.constant 0 : i32
    %c0_i32_0 = arith.constant 0 : i32
    return %arg0, %c0_i32, %arg1 : i32, i32, i32
  }
  func.func @transform_2(%arg0: i32, %arg1: i32, %arg2: i32) -> (i32, i32, i32) {
    %c0_i32 = arith.constant 0 : i32
    %c0_i32_0 = arith.constant 0 : i32
    return %arg0, %c0_i32, %arg1 : i32, i32, i32
  }
  func.func @transform_3(%arg0: i32, %arg1: i32, %arg2: i32) -> (i32, i32) {
    %c1_i32 = arith.constant 1 : i32
    %0 = arith.muli %arg0, %c1_i32 : i32
    %1 = arith.addi %0, %arg1 : i32
    %c0_i32 = arith.constant 0 : i32
    return %arg2, %1 : i32, i32
  }
}

</mosaic_0001>

<bundles_post_ra>
// kernel: tpu_custom_call.1
= control target key start
LH: loop header
LB: loop body
LE: loop exit
PB: predicated region body
PF: predicated region fallthrough
CT: control target
= control target key end

     0   :  { %s1981_s0 = inlined_call_operand.hbm [shape: f32[512,256], index: 0, kind: input, shape index: {}]   ;;  %s1982_s1 = inlined_call_operand.hbm [shape: f32[2,128,256], index: 1, kind: input, shape index: {}]   ;;  %s1983_s2 = inlined_call_operand.hbm [shape: f32[2,1,256], index: 2, kind: input, shape index: {}]   ;;  %s1984_s3 = inlined_call_operand.hbm [shape: f32[512,512], index: 3, kind: output, shape index: {}]  }
   0x1   :  { %1991 = sst [smem:[#allocation18_spill]] %s1982_s1 }
   0x2   :  { %8 = vsyncpa [#allocation3], 0 }
   0x3   :  { %10 = vsyncpa [#allocation3 + $0x1], 0 }
   0x4   :  { %11 = vsyncpa [#allocation6], 0 }
   0x5   :  { %13 = vsyncpa [#allocation6 + $0x1], 0 }
   0x6   :  { %14 = vsyncpa [#allocation4], 0 }
   0x7   :  { %16 = vsyncpa [#allocation4 + $0x1], 0  ;;  %s1455_s12 = smov 0   ;;  %s1457_s13 = smov 0  }
   0x8   :  { %s1459_s14 = smov 0   ;;  %s1461_s15 = smov 0  }
   0x9   :  { %s1463_s16 = smov 0   ;;  %s1465_s17 = smov 0  }
   0xa LB: > { %1992 = sst [smem:[#allocation12_spill]] %s1406_s12  ;;  %s1486_s18 = sadd.s32 4294967295, %s1426_s17   ;;  %s1426_s17 = sphi %s1465_s17, %s22_s17   ;;  %s1422_s16 = sphi %s1463_s16, %s2014_s16   ;;  %s1418_s15 = sphi %s1461_s15, %s2013_s15   ;;  %s1414_s14 = sphi %s1459_s14, %s2009_s14   ;;  %s1410_s13 = sphi %s1457_s13, %s2012_s13   ;;  %s1406_s12 = sphi %s1455_s12, %s2011_s12  }
   0xb   : > { %1993 = sst [smem:[#allocation13_spill]] %s1414_s14  ;;  %s1117_s19 = sadd.s32 4294967294, %s1426_s17  }
   0xc   : > { %1994 = sst [smem:[#allocation14_spill]] %s1426_s17  ;;  %s41_s20 = sadd.s32 1, %s1422_s16 }
   0xd   : > { %s50_s21 = sadd.s32 1, %s1414_s14  ;;  %p43_p0 = scmp.ge.s32.totalorder %s41_s20, 2 }
   0xe   : > { %p57_p1 = scmp.ne.s32.totalorder %s1414_s14, %s1410_s13  ;;  %p58_p2 = scmp.eq.s32.totalorder %s1426_s17, 0 }
   0xf   : > { %p63_p3 = scmp.ne.s32.totalorder %s1410_s13, %s1406_s12  ;;  %s2016_s20 = smov (%p43_p0, %s41_s20), 0 }
  0x10   : > { %1995 = sst [smem:[#allocation15_spill]] %s2016_s20  ;;  %p1498_p4 = por %p58_p2, %p57_p1 }
  0x11   : > { %p64_p5 = scmp.eq.s32.totalorder %s1486_s18, 0  ;;  %s46_s23 = ssub.s32 %s1422_s16, %s2016_s20 }
  0x12   : > { %p147_p6 = scmp.eq.s32.totalorder %s1486_s18, 1  ;;  %p48_p7 = scmp.eq.s32.totalorder %s46_s23, 0 }
  0x13   : > { %p1506_p8 = por %p64_p5, %p63_p3  ;;  %p153_p10 = scmp.eq.s32.totalorder %s1117_s19, 1 }
  0x14   : > { %p1510_p9 = por %p147_p6, %p57_p1  ;;  %p1119_p12 = scmp.ge.s32.totalorder %s1426_s17, 2 }
  0x15   : > { %s1515_s26 = scalar_select %p48_p7, %s1414_s14, %s50_s21  }
  0x16   : > { %p1517_p11 = por %p153_p10, %p63_p3  ;;  %p1193_p13 = scmp.lt.s32.totalorder %s1426_s17, 2 }
  0x17   : > { %1999 = sst [smem:[#allocation16_spill]] %s1515_s26  ;;  %s1524_s28 = sand.u32 1, %s1414_s14  }
  0x18   : > { %s2000_s27 = scalar_select %p1517_p11, 1, 0 }
  0x19   : > { %s197_s29 = sand.u32 1, %s1426_s17   ;;  %p1529_p0 = pnand %p1193_p13, %p1498_p4 }
  0x1a   : > { %2001 = sst [smem:[#allocation17_spill]] %s2000_s27  ;;  %s1122_s4 = sshll.u32 %s1524_s28, 8 }
  0x1b   : > { %s1137_s5 = sshll.u32 %s1422_s16, 8  ;;  %s2003_s1 = sld [smem:[#allocation18_spill]] }
  0x1c   : > { %s201_s9 = scalar_lea.vmem [#allocation5], %s1122_s4  ;;  %s198_s19 = scalar_lea.sflag [#allocation6], %s197_s29 }
  0x1d   : > { %s211_s10 = sshll.u32 %s201_s9, 4  ;;  %s1428_s21 = smov 256   ;;  %s212_s10 = int_to_ptr.vmem [resolvable:$true] %s211_s10 }
  0x1e   : > { %s1429_s22 = smov 16   ;;  %p1127_p1 = scmp.ge.s32.totalorder %s1426_s17, 1 }
  0x1f   : > { %p240_p2 = scmp.lt.s32.totalorder %s1426_s17, 3  ;;  %s1120_s4 = sshll.u32 %s1524_s28, 9 }
  0x20   : > { %s177_s9 = scalar_lea.vmem [#allocation2], %s1120_s4  ;;  %s1125_s20 = sshll.u32 %s1524_s28, 1 }
  0x21   : > { %s208_s8 = scalar_lea.hbm %s2003_s1, %s1137_s5  ;;  %p1542_p3 = pnand %p1127_p1, %p240_p2 }
  0x22   : > { %s209_s11 = sshll.u32 %s208_s8, 4  ;;  %s1121_s5 = sshll.u32 %s1422_s16, 3  ;;  %s210_s11 = int_to_ptr.hbm [resolvable:$true] %s209_s11 }
  0x23   : > { %1185 = dma.hbm_to_vmem [thread:$0]  (!%p1529_p0), %s210_s11, 4096, %s212_s10, %s198_s19, %s1428_s21, %s1428_s21, %s1429_s22  }
  0x24   : > { %s184_s8 = scalar_lea.hbm %s1981_s0, %s1121_s5  ;;  %s187_s1 = sshll.u32 %s177_s9, 4  ;;  %s188_s1 = int_to_ptr.vmem [resolvable:$true] %s187_s1 }
  0x25   : > { %s185_s29 = sshll.u32 %s184_s8, 4  ;;  %s174_s10 = scalar_lea.sflag [#allocation3], %s1524_s28  ;;  %s186_s29 = int_to_ptr.hbm [resolvable:$true] %s185_s29 }
  0x26   : > { %s1430_s11 = smov 128   ;;  %s1431_s22 = smov 8  }
  0x27   : > { %1182 = dma.hbm_to_vmem [thread:$0]  (!%p1529_p0), %s186_s29, 8192, %s188_s1, %s174_s10, %s1428_s21, %s1430_s11, %s1431_s22  }
  0x28   : > { %s1126_s26 = sshll.u32 %s1422_s16, 1  ;;  %s225_s6 = scalar_lea.vmem [#allocation7], %s1125_s20 }
  0x29   : > { %s231_s27 = scalar_lea.hbm %s1983_s2, %s1126_s26  ;;  %s235_s5 = sshll.u32 %s225_s6, 4  ;;  %s236_s5 = int_to_ptr.vmem [resolvable:$true] %s235_s5 }
  0x2a   : > { %s233_s12 = sshll.u32 %s231_s27, 4  ;;  %244 = sbr.rel (%p1542_p3) target bundleno = 471 (0x1d7), region = 32  ;;  %s234_s12 = int_to_ptr.hbm [resolvable:$true] %s233_s12 }
  0x2b   : > { %1188 = dma.hbm_to_vmem [thread:$0]  (!%p1529_p0), %s234_s12, 32, %s236_s5, %s198_s19  }
  0x2c   : > { %s1564_s4 = sand.u32 (!%p1542_p3), 1, %s1410_s13  }
  0x2d   : > { %s1128_s1 = sshll.u32 (!%p1542_p3), %s1564_s4, 9  ;;  %s247_s28 = scalar_lea.sflag (!%p1542_p3), [#allocation3], %s1564_s4 }
  0x2e   : > { %s1568_s14 = scalar_lea.vmem (!%p1542_p3), [#allocation2], %s1128_s1 }
  0x2f   : > { %1393 = dma.done.wait (%p1506_p8), %s247_s28, 8192  }
  0x30   : > { %1395 = vsyncadd (%p1506_p8), %s247_s28, 4294959104  ;;  %s256_s12 = sand.u32 1, %s1486_s18   ;;  %s1129_s17 = sshll.u32 %s1564_s4, 8 }
  0x31   : > { %s257_s20 = scalar_lea.sflag [#allocation6], %s256_s12  ;;  %s1576_s26 = scalar_lea.vmem [#allocation5], %s1129_s17 }
  0x32   : > { %1397 = dma.done.wait (%p1506_p8), %s257_s20, 4128  }
  0x33   : > { %1399 = vsyncadd (%p1506_p8), %s257_s20, 4294963168  ;;  %v404_v0 = vld [vmem:[%s1576_s26 + $0xf0] sm:$0xff]  ;;  %v405_v1 = vld [vmem:[%s1576_s26 + $0xf8] sm:$0xff]  ;;  %s1130_s18 = sshll.u32 %s1564_s4, 1  ;;  %s1131_s27 = sshll.u32 %s1564_s4, 10 }
  0x34   : > { %v402_v2 = vld [vmem:[%s1576_s26 + $0xe0] sm:$0xff]  ;;  %1139 = vmatpush.msra.mxu2 %v404_v0  ;;  %1155 = vmatpush.msra.mxu3 %v405_v1  ;;  %v403_v3 = vld [vmem:[%s1576_s26 + $0xe8] sm:$0xff]  ;;  %v400_v4 = vld [vmem:[%s1576_s26 + $0xd0] sm:$0xff]  ;;  %s270_s24 = scalar_lea.vmem [#allocation7], %s1130_s18  ;;  %s1656_s30 = scalar_lea.vmem [#allocation8], %s1131_s27 }
  0x35   : > { %v401_v5 = vld [vmem:[%s1576_s26 + $0xd8] sm:$0xff]  ;;  %412 = vmatpush.msra.mxu0 %v404_v0  ;;  %621 = vmatpush.msra.mxu1 %v405_v1  ;;  %v398_v6 = vld [vmem:[%s1576_s26 + $0xc0] sm:$0xff]  ;;  %v399_v7 = vld [vmem:[%s1576_s26 + $0xc8] sm:$0xff]  ;;  %s1138_s19 = sshll.u32 %s1418_s15, 4  ;;  %s975_s15 = sshll.u32 %s1656_s30, 4  ;;  %s976_s15 = int_to_ptr.vmem [resolvable:$true] %s975_s15 }
  0x36   : > { %1140 = vmatpush.msra.mxu2 %v402_v2  ;;  %1156 = vmatpush.msra.mxu3 %v403_v3  ;;  %v396_v8 = vld [vmem:[%s1576_s26 + $0xb0] sm:$0xff]  ;;  %v397_v9 = vld [vmem:[%s1576_s26 + $0xb8] sm:$0xff]  ;;  %v394_v10 = vld [vmem:[%s1576_s26 + $0xa0] sm:$0xff]  ;;  %s974_s7 = scalar_lea.hbm %s1984_s3, %s1138_s19  ;;  %s959_s29 = scalar_lea.sflag [#allocation4], %s1564_s4 }
  0x37   : > { %413 = vmatpush.msra.mxu0 %v402_v2  ;;  %622 = vmatpush.msra.mxu1 %v403_v3  ;;  %v395_v11 = vld [vmem:[%s1576_s26 + $0xa8] sm:$0xff]  ;;  %v392_v12 = vld [vmem:[%s1576_s26 + $0x90] sm:$0xff]  ;;  %v393_v13 = vld [vmem:[%s1576_s26 + $0x98] sm:$0xff]  ;;  %s977_s8 = sshll.u32 %s974_s7, 4  ;;  %s1360_s6 = scalar_lea.hbm %s1984_s3, 2048  ;;  %s978_s8 = int_to_ptr.hbm [resolvable:$true] %s977_s8 }
  0x38   : > { %1141 = vmatpush.msra.mxu2 %v400_v4  ;;  %1157 = vmatpush.msra.mxu3 %v401_v5  ;;  %v390_v14 = vld [vmem:[%s1576_s26 + $0x80] sm:$0xff]  ;;  %v391_v15 = vld [vmem:[%s1576_s26 + $0x88] sm:$0xff]  ;;  %v388_v16 = vld [vmem:[%s1576_s26 + $0x70] sm:$0xff]  ;;  %s1354_s9 = sshra.s32 %s978_s8, 4  ;;  %s1355_s9 = int_to_ptr.hbm [resolvable:$true] %s1354_s9 }
  0x39   : > { %414 = vmatpush.msra.mxu0 %v400_v4  ;;  %623 = vmatpush.msra.mxu1 %v401_v5  ;;  %v389_v17 = vld [vmem:[%s1576_s26 + $0x78] sm:$0xff]  ;;  %v386_v18 = vld [vmem:[%s1576_s26 + $0x60] sm:$0xff]  ;;  %v387_v19 = vld [vmem:[%s1576_s26 + $0x68] sm:$0xff]  ;;  %s1356_s10 = scalar_lea.hbm %s1355_s9, 1024  ;;  %p1361_p7 = scmp.lt.s32.totalorder %s1355_s9, %s1984_s3 }
  0x3a   : > { %1142 = vmatpush.msra.mxu2 %v398_v6  ;;  %1158 = vmatpush.msra.mxu3 %v399_v7  ;;  %v384_v20 = vld [vmem:[%s1576_s26 + $0x50] sm:$0xff]  ;;  %v385_v21 = vld [vmem:[%s1576_s26 + $0x58] sm:$0xff]  ;;  %v382_v22 = vld [vmem:[%s1576_s26 + $0x40] sm:$0xff]  ;;  %p1357_p4 = scmp.ne.s32.totalorder %s1355_s9, %s1356_s10  ;;  %p1362_p8 = scmp.lt.s32.totalorder %s1360_s6, %s1356_s10 }
  0x3b   : > { %415 = vmatpush.msra.mxu0 %v398_v6  ;;  %624 = vmatpush.msra.mxu1 %v399_v7  ;;  %v383_v23 = vld [vmem:[%s1576_s26 + $0x48] sm:$0xff]  ;;  %v380_v24 = vld [vmem:[%s1576_s26 + $0x30] sm:$0xff]  ;;  %v381_v25 = vld [vmem:[%s1576_s26 + $0x38] sm:$0xff] }
  0x3c   : > { %1143 = vmatpush.msra.mxu2 %v396_v8  ;;  %1159 = vmatpush.msra.mxu3 %v397_v9  ;;  %v378_v26 = vld [vmem:[%s1576_s26 + $0x20] sm:$0xff]  ;;  %v379_v27 = vld [vmem:[%s1576_s26 + $0x28] sm:$0xff]  ;;  %v376_v28 = vld [vmem:[%s1576_s26 + $0x10] sm:$0xff]  ;;  %p1358_p5 = pnand %p1357_p4, %p1510_p9  ;;  %p1363_p10 = por %p1362_p8, %p1361_p7 }
  0x3d   : > { %416 = vmatpush.msra.mxu0 %v396_v8  ;;  %625 = vmatpush.msra.mxu1 %v397_v9  ;;  %v377_v29 = vld [vmem:[%s1576_s26 + $0x18] sm:$0xff]  ;;  %v374_v30 = vld [vmem:[%s1576_s26] sm:$0xff]  ;;  %v375_v31 = vld [vmem:[%s1576_s26 + $0x8] sm:$0xff] }
  0x3e   : > { %1144 = vmatpush.msra.mxu2 %v394_v10  ;;  %1160 = vmatpush.msra.mxu3 %v395_v11  ;;  %v342_v32 = vld [vmem:[%s1568_s14 + $0x100] sm:$0xff]  ;;  %v343_v34 = vld [vmem:[%s1568_s14 + $0x108] sm:$0xff]  ;;  %v344_v36 = vld [vmem:[%s1568_s14 + $0x110] sm:$0xff]  ;;  %p1359_p6 = pneg %p1358_p5 }
  0x3f   : > { %417 = vmatpush.msra.mxu0 %v394_v10  ;;  %626 = vmatpush.msra.mxu1 %v395_v11  ;;  %v310_v33 = vld [vmem:[%s1568_s14] sm:$0xff]  ;;  %v311_v35 = vld [vmem:[%s1568_s14 + $0x8] sm:$0xff]  ;;  %v312_v37 = vld [vmem:[%s1568_s14 + $0x10] sm:$0xff] }
  0x40   : > { %1145 = vmatpush.msra.mxu2 %v392_v12  ;;  %1161 = vmatpush.msra.mxu3 %v393_v13  ;;  %v345_v38 = vld [vmem:[%s1568_s14 + $0x118] sm:$0xff]  ;;  %v346_v40 = vld [vmem:[%s1568_s14 + $0x120] sm:$0xff]  ;;  %v347_v42 = vld [vmem:[%s1568_s14 + $0x128] sm:$0xff]  ;;  %p1364_p13 = pnand %p1363_p10, %p1359_p6 }
  0x41   : > { %418 = vmatpush.msra.mxu0 %v392_v12  ;;  %627 = vmatpush.msra.mxu1 %v393_v13  ;;  %v313_v39 = vld [vmem:[%s1568_s14 + $0x18] sm:$0xff]  ;;  %v314_v41 = vld [vmem:[%s1568_s14 + $0x20] sm:$0xff]  ;;  %v315_v43 = vld [vmem:[%s1568_s14 + $0x28] sm:$0xff] }
  0x42   : > { %1146 = vmatpush.msra.mxu2 %v390_v14  ;;  %1162 = vmatpush.msra.mxu3 %v391_v15  ;;  %v348_v44 = vld [vmem:[%s1568_s14 + $0x130] sm:$0xff]  ;;  %v349_v46 = vld [vmem:[%s1568_s14 + $0x138] sm:$0xff]  ;;  %v350_v48 = vld [vmem:[%s1568_s14 + $0x140] sm:$0xff] }
  0x43   : > { %419 = vmatpush.msra.mxu0 %v390_v14  ;;  %628 = vmatpush.msra.mxu1 %v391_v15  ;;  %v316_v45 = vld [vmem:[%s1568_s14 + $0x30] sm:$0xff]  ;;  %v317_v47 = vld [vmem:[%s1568_s14 + $0x38] sm:$0xff]  ;;  %v318_v49 = vld [vmem:[%s1568_s14 + $0x40] sm:$0xff] }
  0x44   : > { %1147 = vmatpush.msra.mxu2 %v388_v16  ;;  %1163 = vmatpush.msra.mxu3 %v389_v17  ;;  %v351_v50 = vld [vmem:[%s1568_s14 + $0x148] sm:$0xff]  ;;  %v352_v52 = vld [vmem:[%s1568_s14 + $0x150] sm:$0xff]  ;;  %v353_v54 = vld [vmem:[%s1568_s14 + $0x158] sm:$0xff] }
  0x45   : > { %420 = vmatpush.msra.mxu0 %v388_v16  ;;  %629 = vmatpush.msra.mxu1 %v389_v17  ;;  %v319_v51 = vld [vmem:[%s1568_s14 + $0x48] sm:$0xff]  ;;  %v320_v53 = vld [vmem:[%s1568_s14 + $0x50] sm:$0xff]  ;;  %v321_v55 = vld [vmem:[%s1568_s14 + $0x58] sm:$0xff] }
  0x46   : > { %1148 = vmatpush.msra.mxu2 %v386_v18  ;;  %1164 = vmatpush.msra.mxu3 %v387_v19  ;;  %v354_v56 = vld [vmem:[%s1568_s14 + $0x160] sm:$0xff]  ;;  %v355_v58 = vld [vmem:[%s1568_s14 + $0x168] sm:$0xff]  ;;  %v356_v60 = vld [vmem:[%s1568_s14 + $0x170] sm:$0xff] }
  0x47   : > { %421 = vmatpush.msra.mxu0 %v386_v18  ;;  %630 = vmatpush.msra.mxu1 %v387_v19  ;;  %v322_v57 = vld [vmem:[%s1568_s14 + $0x60] sm:$0xff]  ;;  %v323_v59 = vld [vmem:[%s1568_s14 + $0x68] sm:$0xff]  ;;  %v324_v61 = vld [vmem:[%s1568_s14 + $0x70] sm:$0xff] }
  0x48   : > { %1149 = vmatpush.msra.mxu2 %v384_v20  ;;  %1165 = vmatpush.msra.mxu3 %v385_v21  ;;  %v357_v62 = vld [vmem:[%s1568_s14 + $0x178] sm:$0xff]  ;;  %v406_v0 = vld [vmem:[%s270_s24] sm:$0x3]  ;;  %v359_v13 = vld [vmem:[%s1568_s14 + $0x188] sm:$0xff] }
  0x49   : > { %422 = vmatpush.msra.mxu0 %v384_v20  ;;  %631 = vmatpush.msra.mxu1 %v385_v21  ;;  %v325_v63 = vld [vmem:[%s1568_s14 + $0x78] sm:$0xff]  ;;  %v1648_v1 = vperm.slane %v406_v0, 0  ;;  %v1650_v2 = vperm.slane %v406_v0, 1  ;;  %v358_v3 = vld [vmem:[%s1568_s14 + $0x180] sm:$0xff]  ;;  %v327_v16 = vld [vmem:[%s1568_s14 + $0x88] sm:$0xff] }
  0x4a   : > { %1150 = vmatpush.msra.mxu2 %v382_v22  ;;  %1166 = vmatpush.msra.mxu3 %v383_v23  ;;  %v326_v6 = vld [vmem:[%s1568_s14 + $0x80] sm:$0xff] }
  0x4b   : > { %423 = vmatpush.msra.mxu0 %v382_v22  ;;  %632 = vmatpush.msra.mxu1 %v383_v23  ;;  %v360_v23 = vld [vmem:[%s1568_s14 + $0x190] sm:$0xff] }
  0x4c   : > { %1151 = vmatpush.msra.mxu2 %v380_v24  ;;  %1167 = vmatpush.msra.mxu3 %v381_v25 }
  0x4d   : > { %424 = vmatpush.msra.mxu0 %v380_v24  ;;  %633 = vmatpush.msra.mxu1 %v381_v25 }
  0x4e   : > { %1152 = vmatpush.msra.mxu2 %v378_v26  ;;  %1168 = vmatpush.msra.mxu3 %v379_v27 }
  0x4f   : > { %425 = vmatpush.msra.mxu0 %v378_v26  ;;  %634 = vmatpush.msra.mxu1 %v379_v27  ;;  %v328_v26 = vld [vmem:[%s1568_s14 + $0x90] sm:$0xff] }
  0x50   : > { %1153 = vmatpush.msra.mxu2 %v376_v28  ;;  %1169 = vmatpush.msra.mxu3 %v377_v29 }
  0x51   : > { %426 = vmatpush.msra.mxu0 %v376_v28  ;;  %635 = vmatpush.msra.mxu1 %v377_v29 }
  0x52   : > { %1154 = vmatpush.msra.mxu2 %v374_v30  ;;  %1170 = vmatpush.msra.mxu3 %v375_v31 }
  0x53   : > { %524 = vmatmul.f32.vlgmr.msra.gmra.mxu2 %v342_v32  ;;  %733 = vmatmul.f32.vlgmr.msra.gmra.mxu3 %v342_v32 }
  0x54   : > { %427 = vmatpush.msra.mxu0 %v374_v30  ;;  %636 = vmatpush.msra.mxu1 %v375_v31 }
  0x55   : > { %428 = vmatmul.f32.vlgmr.msra.gmra.mxu0 %v310_v33  ;;  %637 = vmatmul.f32.vlgmr.msra.gmra.mxu1 %v310_v33  ;;  %v361_v33 = vld [vmem:[%s1568_s14 + $0x198] sm:$0xff] }
  0x5b   : > { %527 = vmatmul.f32.gmra.mxu2 %v343_v34  ;;  %736 = vmatmul.f32.gmra.mxu3 %v343_v34 }
  0x5d   : > { %431 = vmatmul.f32.gmra.mxu0 %v311_v35  ;;  %640 = vmatmul.f32.gmra.mxu1 %v311_v35 }
  0x63   : > { %530 = vmatmul.f32.gmra.mxu2 %v344_v36  ;;  %739 = vmatmul.f32.gmra.mxu3 %v344_v36  ;;  %v329_v36 = vld [vmem:[%s1568_s14 + $0x98] sm:$0xff] }
  0x65   : > { %434 = vmatmul.f32.gmra.mxu0 %v312_v37  ;;  %643 = vmatmul.f32.gmra.mxu1 %v312_v37 }
  0x6b   : > { %533 = vmatmul.f32.gmra.mxu2 %v345_v38  ;;  %742 = vmatmul.f32.gmra.mxu3 %v345_v38 }
  0x6d   : > { %437 = vmatmul.f32.gmra.mxu0 %v313_v39  ;;  %646 = vmatmul.f32.gmra.mxu1 %v313_v39 }
  0x73   : > { %536 = vmatmul.f32.gmra.mxu2 %v346_v40  ;;  %745 = vmatmul.f32.gmra.mxu3 %v346_v40 }
  0x75   : > { %440 = vmatmul.f32.gmra.mxu0 %v314_v41  ;;  %649 = vmatmul.f32.gmra.mxu1 %v314_v41 }
  0x7b   : > { %539 = vmatmul.f32.gmra.mxu2 %v347_v42  ;;  %748 = vmatmul.f32.gmra.mxu3 %v347_v42 }
  0x7d   : > { %443 = vmatmul.f32.gmra.mxu0 %v315_v43  ;;  %652 = vmatmul.f32.gmra.mxu1 %v315_v43  ;;  %v362_v43 = vld [vmem:[%s1568_s14 + $0x1a0] sm:$0xff] }
  0x83   : > { %542 = vmatmul.f32.gmra.mxu2 %v348_v44  ;;  %751 = vmatmul.f32.gmra.mxu3 %v348_v44 }
  0x85   : > { %446 = vmatmul.f32.gmra.mxu0 %v316_v45  ;;  %655 = vmatmul.f32.gmra.mxu1 %v316_v45 }
  0x8b   : > { %545 = vmatmul.f32.gmra.mxu2 %v349_v46  ;;  %754 = vmatmul.f32.gmra.mxu3 %v349_v46  ;;  %v330_v46 = vld [vmem:[%s1568_s14 + $0xa0] sm:$0xff] }
  0x8d   : > { %449 = vmatmul.f32.gmra.mxu0 %v317_v47  ;;  %658 = vmatmul.f32.gmra.mxu1 %v317_v47 }
  0x93   : > { %548 = vmatmul.f32.gmra.mxu2 %v350_v48  ;;  %757 = vmatmul.f32.gmra.mxu3 %v350_v48 }
  0x95   : > { %452 = vmatmul.f32.gmra.mxu0 %v318_v49  ;;  %661 = vmatmul.f32.gmra.mxu1 %v318_v49 }
  0x9b   : > { %551 = vmatmul.f32.gmra.mxu2 %v351_v50  ;;  %760 = vmatmul.f32.gmra.mxu3 %v351_v50 }
  0x9d   : > { %455 = vmatmul.f32.gmra.mxu0 %v319_v51  ;;  %664 = vmatmul.f32.gmra.mxu1 %v319_v51 }
  0xa3   : > { %554 = vmatmul.f32.gmra.mxu2 %v352_v52  ;;  %763 = vmatmul.f32.gmra.mxu3 %v352_v52 }
  0xa5   : > { %458 = vmatmul.f32.gmra.mxu0 %v320_v53  ;;  %667 = vmatmul.f32.gmra.mxu1 %v320_v53  ;;  %v363_v53 = vld [vmem:[%s1568_s14 + $0x1a8] sm:$0xff] }
  0xab   : > { %557 = vmatmul.f32.gmra.mxu2 %v353_v54  ;;  %766 = vmatmul.f32.gmra.mxu3 %v353_v54 }
  0xad   : > { %461 = vmatmul.f32.gmra.mxu0 %v321_v55  ;;  %670 = vmatmul.f32.gmra.mxu1 %v321_v55 }
  0xb3   : > { %560 = vmatmul.f32.gmra.mxu2 %v354_v56  ;;  %769 = vmatmul.f32.gmra.mxu3 %v354_v56  ;;  %v331_v56 = vld [vmem:[%s1568_s14 + $0xa8] sm:$0xff] }
  0xb5   : > { %464 = vmatmul.f32.gmra.mxu0 %v322_v57  ;;  %673 = vmatmul.f32.gmra.mxu1 %v322_v57 }
  0xbb   : > { %563 = vmatmul.f32.gmra.mxu2 %v355_v58  ;;  %772 = vmatmul.f32.gmra.mxu3 %v355_v58 }
  0xbd   : > { %467 = vmatmul.f32.gmra.mxu0 %v323_v59  ;;  %676 = vmatmul.f32.gmra.mxu1 %v323_v59 }
  0xc3   : > { %566 = vmatmul.f32.gmra.mxu2 %v356_v60  ;;  %775 = vmatmul.f32.gmra.mxu3 %v356_v60 }
  0xc5   : > { %470 = vmatmul.f32.gmra.mxu0 %v324_v61  ;;  %679 = vmatmul.f32.gmra.mxu1 %v324_v61 }
  0xcb   : > { %569 = vmatmul.f32.gmra.mxu2 %v357_v62  ;;  %778 = vmatmul.f32.gmra.mxu3 %v357_v62 }
  0xcd   : > { %473 = vmatmul.f32.gmra.mxu0 %v325_v63  ;;  %682 = vmatmul.f32.gmra.mxu1 %v325_v63  ;;  %v364_v63 = vld [vmem:[%s1568_s14 + $0x1b0] sm:$0xff] }
  0xd2   : > { %v429_v4 = vpop.f32.mrf.mxu0  ;;  %v638_v5 = vpop.f32.mrf.mxu1 }
  0xd3   : > { %572 = vmatmul.f32.gmra.mxu2 %v358_v3  ;;  %781 = vmatmul.f32.gmra.mxu3 %v358_v3  ;;  %v430_v7 = vadd.f32 %v429_v4, %v1648_v1  ;;  %v639_v8 = vadd.f32 %v638_v5, %v1650_v2  ;;  %v332_v4 = vld [vmem:[%s1568_s14 + $0xb0] sm:$0xff] }
  0xd5   : > { %830 = vst [vmem:[%s1656_s30] sm:$0xff] %v430_v7  ;;  %476 = vmatmul.f32.gmra.mxu0 %v326_v6  ;;  %685 = vmatmul.f32.gmra.mxu1 %v326_v6 }
  0xd6   : > { %v525_v9 = vpop.f32.mrf.mxu2  ;;  %831 = vst [vmem:[%s1656_s30 + $0x8] sm:$0xff] %v639_v8  ;;  %v734_v10 = vpop.f32.mrf.mxu3 }
  0xd7   : > { %v526_v11 = vadd.f32 %v525_v9, %v1648_v1  ;;  %v735_v12 = vadd.f32 %v734_v10, %v1650_v2 }
  0xd9   : > { %894 = vst [vmem:[%s1656_s30 + $0x200] sm:$0xff] %v526_v11  ;;  %v365_v11 = vld [vmem:[%s1568_s14 + $0x1b8] sm:$0xff] }
  0xda   : > { %895 = vst [vmem:[%s1656_s30 + $0x208] sm:$0xff] %v735_v12  ;;  %v432_v14 = vpop.f32.mrf.mxu0  ;;  %v641_v15 = vpop.f32.mrf.mxu1 }
  0xdb   : > { %575 = vmatmul.f32.gmra.mxu2 %v359_v13  ;;  %784 = vmatmul.f32.gmra.mxu3 %v359_v13  ;;  %v433_v17 = vadd.f32 %v432_v14, %v1648_v1  ;;  %v642_v18 = vadd.f32 %v641_v15, %v1650_v2  ;;  %v333_v14 = vld [vmem:[%s1568_s14 + $0xb8] sm:$0xff] }
  0xdd   : > { %832 = vst [vmem:[%s1656_s30 + $0x10] sm:$0xff] %v433_v17  ;;  %479 = vmatmul.f32.gmra.mxu0 %v327_v16  ;;  %688 = vmatmul.f32.gmra.mxu1 %v327_v16 }
  0xde   : > { %v528_v19 = vpop.f32.mrf.mxu2  ;;  %833 = vst [vmem:[%s1656_s30 + $0x18] sm:$0xff] %v642_v18  ;;  %v737_v20 = vpop.f32.mrf.mxu3 }
  0xdf   : > { %v529_v21 = vadd.f32 %v528_v19, %v1648_v1  ;;  %v738_v22 = vadd.f32 %v737_v20, %v1650_v2 }
  0xe1   : > { %896 = vst [vmem:[%s1656_s30 + $0x210] sm:$0xff] %v529_v21  ;;  %v366_v21 = vld [vmem:[%s1568_s14 + $0x1c0] sm:$0xff] }
  0xe2   : > { %897 = vst [vmem:[%s1656_s30 + $0x218] sm:$0xff] %v738_v22  ;;  %v435_v24 = vpop.f32.mrf.mxu0  ;;  %v644_v25 = vpop.f32.mrf.mxu1 }
  0xe3   : > { %578 = vmatmul.f32.gmra.mxu2 %v360_v23  ;;  %787 = vmatmul.f32.gmra.mxu3 %v360_v23  ;;  %v436_v27 = vadd.f32 %v435_v24, %v1648_v1  ;;  %v645_v28 = vadd.f32 %v644_v25, %v1650_v2  ;;  %v334_v24 = vld [vmem:[%s1568_s14 + $0xc0] sm:$0xff] }
  0xe5   : > { %834 = vst [vmem:[%s1656_s30 + $0x20] sm:$0xff] %v436_v27  ;;  %482 = vmatmul.f32.gmra.mxu0 %v328_v26  ;;  %691 = vmatmul.f32.gmra.mxu1 %v328_v26 }
  0xe6   : > { %v531_v29 = vpop.f32.mrf.mxu2  ;;  %835 = vst [vmem:[%s1656_s30 + $0x28] sm:$0xff] %v645_v28  ;;  %v740_v30 = vpop.f32.mrf.mxu3 }
  0xe7   : > { %v532_v31 = vadd.f32 %v531_v29, %v1648_v1  ;;  %v741_v32 = vadd.f32 %v740_v30, %v1650_v2 }
  0xe9   : > { %898 = vst [vmem:[%s1656_s30 + $0x220] sm:$0xff] %v532_v31  ;;  %v367_v31 = vld [vmem:[%s1568_s14 + $0x1c8] sm:$0xff] }
  0xea   : > { %899 = vst [vmem:[%s1656_s30 + $0x228] sm:$0xff] %v741_v32  ;;  %v438_v34 = vpop.f32.mrf.mxu0  ;;  %v647_v35 = vpop.f32.mrf.mxu1 }
  0xeb   : > { %581 = vmatmul.f32.gmra.mxu2 %v361_v33  ;;  %790 = vmatmul.f32.gmra.mxu3 %v361_v33  ;;  %v439_v37 = vadd.f32 %v438_v34, %v1648_v1  ;;  %v648_v38 = vadd.f32 %v647_v35, %v1650_v2  ;;  %v335_v34 = vld [vmem:[%s1568_s14 + $0xc8] sm:$0xff] }
  0xed   : > { %836 = vst [vmem:[%s1656_s30 + $0x30] sm:$0xff] %v439_v37  ;;  %485 = vmatmul.f32.gmra.mxu0 %v329_v36  ;;  %694 = vmatmul.f32.gmra.mxu1 %v329_v36 }
  0xee   : > { %v534_v39 = vpop.f32.mrf.mxu2  ;;  %837 = vst [vmem:[%s1656_s30 + $0x38] sm:$0xff] %v648_v38  ;;  %v743_v40 = vpop.f32.mrf.mxu3 }
  0xef   : > { %v535_v41 = vadd.f32 %v534_v39, %v1648_v1  ;;  %v744_v42 = vadd.f32 %v743_v40, %v1650_v2 }
  0xf1   : > { %900 = vst [vmem:[%s1656_s30 + $0x230] sm:$0xff] %v535_v41  ;;  %v368_v41 = vld [vmem:[%s1568_s14 + $0x1d0] sm:$0xff] }
  0xf2   : > { %901 = vst [vmem:[%s1656_s30 + $0x238] sm:$0xff] %v744_v42  ;;  %v441_v44 = vpop.f32.mrf.mxu0  ;;  %v650_v45 = vpop.f32.mrf.mxu1 }
  0xf3   : > { %584 = vmatmul.f32.gmra.mxu2 %v362_v43  ;;  %793 = vmatmul.f32.gmra.mxu3 %v362_v43  ;;  %v442_v47 = vadd.f32 %v441_v44, %v1648_v1  ;;  %v651_v48 = vadd.f32 %v650_v45, %v1650_v2  ;;  %v336_v44 = vld [vmem:[%s1568_s14 + $0xd0] sm:$0xff] }
  0xf5   : > { %838 = vst [vmem:[%s1656_s30 + $0x40] sm:$0xff] %v442_v47  ;;  %488 = vmatmul.f32.gmra.mxu0 %v330_v46  ;;  %697 = vmatmul.f32.gmra.mxu1 %v330_v46 }
  0xf6   : > { %v537_v49 = vpop.f32.mrf.mxu2  ;;  %839 = vst [vmem:[%s1656_s30 + $0x48] sm:$0xff] %v651_v48  ;;  %v746_v50 = vpop.f32.mrf.mxu3 }
  0xf7   : > { %v538_v51 = vadd.f32 %v537_v49, %v1648_v1  ;;  %v747_v52 = vadd.f32 %v746_v50, %v1650_v2 }
  0xf9   : > { %902 = vst [vmem:[%s1656_s30 + $0x240] sm:$0xff] %v538_v51  ;;  %v369_v51 = vld [vmem:[%s1568_s14 + $0x1d8] sm:$0xff] }
  0xfa   : > { %903 = vst [vmem:[%s1656_s30 + $0x248] sm:$0xff] %v747_v52  ;;  %v444_v54 = vpop.f32.mrf.mxu0  ;;  %v653_v55 = vpop.f32.mrf.mxu1 }
  0xfb   : > { %587 = vmatmul.f32.gmra.mxu2 %v363_v53  ;;  %796 = vmatmul.f32.gmra.mxu3 %v363_v53  ;;  %v445_v57 = vadd.f32 %v444_v54, %v1648_v1  ;;  %v654_v58 = vadd.f32 %v653_v55, %v1650_v2  ;;  %v337_v54 = vld [vmem:[%s1568_s14 + $0xd8] sm:$0xff] }
  0xfd   : > { %840 = vst [vmem:[%s1656_s30 + $0x50] sm:$0xff] %v445_v57  ;;  %491 = vmatmul.f32.gmra.mxu0 %v331_v56  ;;  %700 = vmatmul.f32.gmra.mxu1 %v331_v56 }
  0xfe   : > { %v540_v59 = vpop.f32.mrf.mxu2  ;;  %841 = vst [vmem:[%s1656_s30 + $0x58] sm:$0xff] %v654_v58  ;;  %v749_v60 = vpop.f32.mrf.mxu3 }
  0xff   : > { %v541_v61 = vadd.f32 %v540_v59, %v1648_v1  ;;  %v750_v62 = vadd.f32 %v749_v60, %v1650_v2 }
 0x101   : > { %904 = vst [vmem:[%s1656_s30 + $0x250] sm:$0xff] %v541_v61  ;;  %v370_v61 = vld [vmem:[%s1568_s14 + $0x1e0] sm:$0xff] }
 0x102   : > { %905 = vst [vmem:[%s1656_s30 + $0x258] sm:$0xff] %v750_v62  ;;  %v447_v0 = vpop.f32.mrf.mxu0  ;;  %v656_v3 = vpop.f32.mrf.mxu1 }
 0x103   : > { %590 = vmatmul.f32.gmra.mxu2 %v364_v63  ;;  %799 = vmatmul.f32.gmra.mxu3 %v364_v63  ;;  %v448_v5 = vadd.f32 %v447_v0, %v1648_v1  ;;  %v657_v6 = vadd.f32 %v656_v3, %v1650_v2  ;;  %v338_v0 = vld [vmem:[%s1568_s14 + $0xe0] sm:$0xff] }
 0x105   : > { %842 = vst [vmem:[%s1656_s30 + $0x60] sm:$0xff] %v448_v5  ;;  %494 = vmatmul.f32.gmra.mxu0 %v332_v4  ;;  %703 = vmatmul.f32.gmra.mxu1 %v332_v4 }
 0x106   : > { %v543_v7 = vpop.f32.mrf.mxu2  ;;  %843 = vst [vmem:[%s1656_s30 + $0x68] sm:$0xff] %v657_v6  ;;  %v752_v8 = vpop.f32.mrf.mxu3 }
 0x107   : > { %v544_v9 = vadd.f32 %v543_v7, %v1648_v1  ;;  %v753_v10 = vadd.f32 %v752_v8, %v1650_v2 }
 0x109   : > { %906 = vst [vmem:[%s1656_s30 + $0x260] sm:$0xff] %v544_v9  ;;  %v371_v9 = vld [vmem:[%s1568_s14 + $0x1e8] sm:$0xff] }
 0x10a   : > { %907 = vst [vmem:[%s1656_s30 + $0x268] sm:$0xff] %v753_v10  ;;  %v450_v12 = vpop.f32.mrf.mxu0  ;;  %v659_v13 = vpop.f32.mrf.mxu1 }
 0x10b   : > { %593 = vmatmul.f32.gmra.mxu2 %v365_v11  ;;  %802 = vmatmul.f32.gmra.mxu3 %v365_v11  ;;  %v451_v15 = vadd.f32 %v450_v12, %v1648_v1  ;;  %v660_v16 = vadd.f32 %v659_v13, %v1650_v2  ;;  %v339_v12 = vld [vmem:[%s1568_s14 + $0xe8] sm:$0xff] }
 0x10d   : > { %844 = vst [vmem:[%s1656_s30 + $0x70] sm:$0xff] %v451_v15  ;;  %497 = vmatmul.f32.gmra.mxu0 %v333_v14  ;;  %706 = vmatmul.f32.gmra.mxu1 %v333_v14 }
 0x10e   : > { %v546_v17 = vpop.f32.mrf.mxu2  ;;  %845 = vst [vmem:[%s1656_s30 + $0x78] sm:$0xff] %v660_v16  ;;  %v755_v18 = vpop.f32.mrf.mxu3 }
 0x10f   : > { %v547_v19 = vadd.f32 %v546_v17, %v1648_v1  ;;  %v756_v20 = vadd.f32 %v755_v18, %v1650_v2 }
 0x111   : > { %908 = vst [vmem:[%s1656_s30 + $0x270] sm:$0xff] %v547_v19  ;;  %v372_v19 = vld [vmem:[%s1568_s14 + $0x1f0] sm:$0xff] }
 0x112   : > { %909 = vst [vmem:[%s1656_s30 + $0x278] sm:$0xff] %v756_v20  ;;  %v453_v22 = vpop.f32.mrf.mxu0  ;;  %v662_v23 = vpop.f32.mrf.mxu1 }
 0x113   : > { %596 = vmatmul.f32.gmra.mxu2 %v366_v21  ;;  %805 = vmatmul.f32.gmra.mxu3 %v366_v21  ;;  %v454_v25 = vadd.f32 %v453_v22, %v1648_v1  ;;  %v663_v26 = vadd.f32 %v662_v23, %v1650_v2  ;;  %v340_v22 = vld [vmem:[%s1568_s14 + $0xf0] sm:$0xff] }
 0x115   : > { %846 = vst [vmem:[%s1656_s30 + $0x80] sm:$0xff] %v454_v25  ;;  %500 = vmatmul.f32.gmra.mxu0 %v334_v24  ;;  %709 = vmatmul.f32.gmra.mxu1 %v334_v24 }
 0x116   : > { %v549_v27 = vpop.f32.mrf.mxu2  ;;  %847 = vst [vmem:[%s1656_s30 + $0x88] sm:$0xff] %v663_v26  ;;  %v758_v28 = vpop.f32.mrf.mxu3 }
 0x117   : > { %v550_v29 = vadd.f32 %v549_v27, %v1648_v1  ;;  %v759_v30 = vadd.f32 %v758_v28, %v1650_v2 }
 0x119   : > { %910 = vst [vmem:[%s1656_s30 + $0x280] sm:$0xff] %v550_v29  ;;  %v373_v29 = vld [vmem:[%s1568_s14 + $0x1f8] sm:$0xff] }
 0x11a   : > { %911 = vst [vmem:[%s1656_s30 + $0x288] sm:$0xff] %v759_v30  ;;  %v456_v32 = vpop.f32.mrf.mxu0  ;;  %v665_v33 = vpop.f32.mrf.mxu1 }
 0x11b   : > { %599 = vmatmul.f32.gmra.mxu2 %v367_v31  ;;  %808 = vmatmul.f32.gmra.mxu3 %v367_v31  ;;  %v457_v35 = vadd.f32 %v456_v32, %v1648_v1  ;;  %v666_v36 = vadd.f32 %v665_v33, %v1650_v2  ;;  %v341_v32 = vld [vmem:[%s1568_s14 + $0xf8] sm:$0xff] }
 0x11d   : > { %848 = vst [vmem:[%s1656_s30 + $0x90] sm:$0xff] %v457_v35  ;;  %503 = vmatmul.f32.gmra.mxu0 %v335_v34  ;;  %712 = vmatmul.f32.gmra.mxu1 %v335_v34 }
 0x11e   : > { %v552_v37 = vpop.f32.mrf.mxu2  ;;  %849 = vst [vmem:[%s1656_s30 + $0x98] sm:$0xff] %v666_v36  ;;  %v761_v38 = vpop.f32.mrf.mxu3 }
 0x11f   : > { %v553_v39 = vadd.f32 %v552_v37, %v1648_v1  ;;  %v762_v40 = vadd.f32 %v761_v38, %v1650_v2 }
 0x121   : > { %912 = vst [vmem:[%s1656_s30 + $0x290] sm:$0xff] %v553_v39 }
 0x122   : > { %913 = vst [vmem:[%s1656_s30 + $0x298] sm:$0xff] %v762_v40  ;;  %v459_v42 = vpop.f32.mrf.mxu0  ;;  %v668_v43 = vpop.f32.mrf.mxu1 }
 0x123   : > { %602 = vmatmul.f32.gmra.mxu2 %v368_v41  ;;  %811 = vmatmul.f32.gmra.mxu3 %v368_v41  ;;  %v460_v45 = vadd.f32 %v459_v42, %v1648_v1  ;;  %v669_v46 = vadd.f32 %v668_v43, %v1650_v2 }
 0x125   : > { %850 = vst [vmem:[%s1656_s30 + $0xa0] sm:$0xff] %v460_v45  ;;  %506 = vmatmul.f32.gmra.mxu0 %v336_v44  ;;  %715 = vmatmul.f32.gmra.mxu1 %v336_v44 }
 0x126   : > { %v555_v47 = vpop.f32.mrf.mxu2  ;;  %851 = vst [vmem:[%s1656_s30 + $0xa8] sm:$0xff] %v669_v46  ;;  %v764_v48 = vpop.f32.mrf.mxu3 }
 0x127   : > { %v556_v49 = vadd.f32 %v555_v47, %v1648_v1  ;;  %v765_v50 = vadd.f32 %v764_v48, %v1650_v2 }
 0x129   : > { %914 = vst [vmem:[%s1656_s30 + $0x2a0] sm:$0xff] %v556_v49 }
 0x12a   : > { %915 = vst [vmem:[%s1656_s30 + $0x2a8] sm:$0xff] %v765_v50  ;;  %v462_v52 = vpop.f32.mrf.mxu0  ;;  %v671_v53 = vpop.f32.mrf.mxu1 }
 0x12b   : > { %605 = vmatmul.f32.gmra.mxu2 %v369_v51  ;;  %814 = vmatmul.f32.gmra.mxu3 %v369_v51  ;;  %v463_v55 = vadd.f32 %v462_v52, %v1648_v1  ;;  %v672_v56 = vadd.f32 %v671_v53, %v1650_v2 }
 0x12d   : > { %852 = vst [vmem:[%s1656_s30 + $0xb0] sm:$0xff] %v463_v55  ;;  %509 = vmatmul.f32.gmra.mxu0 %v337_v54  ;;  %718 = vmatmul.f32.gmra.mxu1 %v337_v54 }
 0x12e   : > { %v558_v57 = vpop.f32.mrf.mxu2  ;;  %853 = vst [vmem:[%s1656_s30 + $0xb8] sm:$0xff] %v672_v56  ;;  %v767_v58 = vpop.f32.mrf.mxu3 }
 0x12f   : > { %v559_v59 = vadd.f32 %v558_v57, %v1648_v1  ;;  %v768_v60 = vadd.f32 %v767_v58, %v1650_v2 }
 0x131   : > { %916 = vst [vmem:[%s1656_s30 + $0x2b0] sm:$0xff] %v559_v59 }
 0x132   : > { %917 = vst [vmem:[%s1656_s30 + $0x2b8] sm:$0xff] %v768_v60  ;;  %v465_v62 = vpop.f32.mrf.mxu0  ;;  %v674_v63 = vpop.f32.mrf.mxu1 }
 0x133   : > { %608 = vmatmul.f32.gmra.mxu2 %v370_v61  ;;  %817 = vmatmul.f32.gmra.mxu3 %v370_v61  ;;  %v466_v3 = vadd.f32 %v465_v62, %v1648_v1  ;;  %v675_v4 = vadd.f32 %v674_v63, %v1650_v2 }
 0x135   : > { %854 = vst [vmem:[%s1656_s30 + $0xc0] sm:$0xff] %v466_v3  ;;  %512 = vmatmul.f32.gmra.mxu0 %v338_v0  ;;  %721 = vmatmul.f32.gmra.mxu1 %v338_v0 }
 0x136   : > { %v561_v5 = vpop.f32.mrf.mxu2  ;;  %855 = vst [vmem:[%s1656_s30 + $0xc8] sm:$0xff] %v675_v4  ;;  %v770_v6 = vpop.f32.mrf.mxu3 }
 0x137   : > { %v562_v7 = vadd.f32 %v561_v5, %v1648_v1  ;;  %v771_v8 = vadd.f32 %v770_v6, %v1650_v2 }
 0x139   : > { %918 = vst [vmem:[%s1656_s30 + $0x2c0] sm:$0xff] %v562_v7 }
 0x13a   : > { %919 = vst [vmem:[%s1656_s30 + $0x2c8] sm:$0xff] %v771_v8  ;;  %v468_v10 = vpop.f32.mrf.mxu0  ;;  %v677_v11 = vpop.f32.mrf.mxu1 }
 0x13b   : > { %611 = vmatmul.f32.gmra.mxu2 %v371_v9  ;;  %820 = vmatmul.f32.gmra.mxu3 %v371_v9  ;;  %v469_v13 = vadd.f32 %v468_v10, %v1648_v1  ;;  %v678_v14 = vadd.f32 %v677_v11, %v1650_v2 }
 0x13d   : > { %856 = vst [vmem:[%s1656_s30 + $0xd0] sm:$0xff] %v469_v13  ;;  %515 = vmatmul.f32.gmra.mxu0 %v339_v12  ;;  %724 = vmatmul.f32.gmra.mxu1 %v339_v12 }
 0x13e   : > { %v564_v15 = vpop.f32.mrf.mxu2  ;;  %857 = vst [vmem:[%s1656_s30 + $0xd8] sm:$0xff] %v678_v14  ;;  %v773_v16 = vpop.f32.mrf.mxu3 }
 0x13f   : > { %v565_v17 = vadd.f32 %v564_v15, %v1648_v1  ;;  %v774_v18 = vadd.f32 %v773_v16, %v1650_v2 }
 0x141   : > { %920 = vst [vmem:[%s1656_s30 + $0x2d0] sm:$0xff] %v565_v17 }
 0x142   : > { %921 = vst [vmem:[%s1656_s30 + $0x2d8] sm:$0xff] %v774_v18  ;;  %v471_v20 = vpop.f32.mrf.mxu0  ;;  %v680_v21 = vpop.f32.mrf.mxu1 }
 0x143   : > { %614 = vmatmul.f32.gmra.mxu2 %v372_v19  ;;  %823 = vmatmul.f32.gmra.mxu3 %v372_v19  ;;  %v472_v23 = vadd.f32 %v471_v20, %v1648_v1  ;;  %v681_v24 = vadd.f32 %v680_v21, %v1650_v2 }
 0x145   : > { %858 = vst [vmem:[%s1656_s30 + $0xe0] sm:$0xff] %v472_v23  ;;  %518 = vmatmul.f32.gmra.mxu0 %v340_v22  ;;  %727 = vmatmul.f32.gmra.mxu1 %v340_v22 }
 0x146   : > { %v567_v25 = vpop.f32.mrf.mxu2  ;;  %859 = vst [vmem:[%s1656_s30 + $0xe8] sm:$0xff] %v681_v24  ;;  %v776_v26 = vpop.f32.mrf.mxu3 }
 0x147   : > { %v568_v27 = vadd.f32 %v567_v25, %v1648_v1  ;;  %v777_v28 = vadd.f32 %v776_v26, %v1650_v2 }
 0x149   : > { %922 = vst [vmem:[%s1656_s30 + $0x2e0] sm:$0xff] %v568_v27 }
 0x14a   : > { %923 = vst [vmem:[%s1656_s30 + $0x2e8] sm:$0xff] %v777_v28  ;;  %v474_v30 = vpop.f32.mrf.mxu0  ;;  %v683_v31 = vpop.f32.mrf.mxu1 }
 0x14b   : > { %617 = vmatmul.f32.gmra.mxu2 %v373_v29  ;;  %826 = vmatmul.f32.gmra.mxu3 %v373_v29  ;;  %v475_v33 = vadd.f32 %v474_v30, %v1648_v1  ;;  %v684_v34 = vadd.f32 %v683_v31, %v1650_v2 }
 0x14d   : > { %860 = vst [vmem:[%s1656_s30 + $0xf0] sm:$0xff] %v475_v33  ;;  %521 = vmatmul.f32.gmra.mxu0 %v341_v32  ;;  %730 = vmatmul.f32.gmra.mxu1 %v341_v32 }
 0x14e   : > { %v570_v35 = vpop.f32.mrf.mxu2  ;;  %861 = vst [vmem:[%s1656_s30 + $0xf8] sm:$0xff] %v684_v34  ;;  %v779_v36 = vpop.f32.mrf.mxu3 }
 0x14f   : > { %v571_v37 = vadd.f32 %v570_v35, %v1648_v1  ;;  %v780_v38 = vadd.f32 %v779_v36, %v1650_v2 }
 0x151   : > { %924 = vst [vmem:[%s1656_s30 + $0x2f0] sm:$0xff] %v571_v37 }
 0x152   : > { %925 = vst [vmem:[%s1656_s30 + $0x2f8] sm:$0xff] %v780_v38  ;;  %v477_v39 = vpop.f32.mrf.mxu0  ;;  %v686_v40 = vpop.f32.mrf.mxu1 }
 0x153   : > { %v478_v41 = vadd.f32 %v477_v39, %v1648_v1  ;;  %v687_v42 = vadd.f32 %v686_v40, %v1650_v2 }
 0x155   : > { %862 = vst [vmem:[%s1656_s30 + $0x100] sm:$0xff] %v478_v41 }
 0x156   : > { %v573_v43 = vpop.f32.mrf.mxu2  ;;  %863 = vst [vmem:[%s1656_s30 + $0x108] sm:$0xff] %v687_v42  ;;  %v782_v44 = vpop.f32.mrf.mxu3 }
 0x157   : > { %v574_v45 = vadd.f32 %v573_v43, %v1648_v1  ;;  %v783_v46 = vadd.f32 %v782_v44, %v1650_v2 }
 0x159   : > { %926 = vst [vmem:[%s1656_s30 + $0x300] sm:$0xff] %v574_v45 }
 0x15a   : > { %927 = vst [vmem:[%s1656_s30 + $0x308] sm:$0xff] %v783_v46  ;;  %v480_v47 = vpop.f32.mrf.mxu0  ;;  %v689_v48 = vpop.f32.mrf.mxu1 }
 0x15b   : > { %v481_v49 = vadd.f32 %v480_v47, %v1648_v1  ;;  %v690_v50 = vadd.f32 %v689_v48, %v1650_v2 }
 0x15d   : > { %864 = vst [vmem:[%s1656_s30 + $0x110] sm:$0xff] %v481_v49 }
 0x15e   : > { %v576_v51 = vpop.f32.mrf.mxu2  ;;  %865 = vst [vmem:[%s1656_s30 + $0x118] sm:$0xff] %v690_v50  ;;  %v785_v52 = vpop.f32.mrf.mxu3 }
 0x15f   : > { %v577_v53 = vadd.f32 %v576_v51, %v1648_v1  ;;  %v786_v54 = vadd.f32 %v785_v52, %v1650_v2 }
 0x161   : > { %928 = vst [vmem:[%s1656_s30 + $0x310] sm:$0xff] %v577_v53 }
 0x162   : > { %929 = vst [vmem:[%s1656_s30 + $0x318] sm:$0xff] %v786_v54  ;;  %v483_v55 = vpop.f32.mrf.mxu0  ;;  %v692_v56 = vpop.f32.mrf.mxu1 }
 0x163   : > { %v484_v57 = vadd.f32 %v483_v55, %v1648_v1  ;;  %v693_v58 = vadd.f32 %v692_v56, %v1650_v2 }
 0x165   : > { %866 = vst [vmem:[%s1656_s30 + $0x120] sm:$0xff] %v484_v57 }
 0x166   : > { %v579_v59 = vpop.f32.mrf.mxu2  ;;  %867 = vst [vmem:[%s1656_s30 + $0x128] sm:$0xff] %v693_v58  ;;  %v788_v60 = vpop.f32.mrf.mxu3 }
 0x167   : > { %v580_v61 = vadd.f32 %v579_v59, %v1648_v1  ;;  %v789_v62 = vadd.f32 %v788_v60, %v1650_v2 }
 0x169   : > { %930 = vst [vmem:[%s1656_s30 + $0x320] sm:$0xff] %v580_v61 }
 0x16a   : > { %931 = vst [vmem:[%s1656_s30 + $0x328] sm:$0xff] %v789_v62  ;;  %v486_v63 = vpop.f32.mrf.mxu0  ;;  %v695_v0 = vpop.f32.mrf.mxu1 }
 0x16b   : > { %v487_v3 = vadd.f32 %v486_v63, %v1648_v1  ;;  %v696_v4 = vadd.f32 %v695_v0, %v1650_v2 }
 0x16d   : > { %868 = vst [vmem:[%s1656_s30 + $0x130] sm:$0xff] %v487_v3 }
 0x16e   : > { %v582_v5 = vpop.f32.mrf.mxu2  ;;  %869 = vst [vmem:[%s1656_s30 + $0x138] sm:$0xff] %v696_v4  ;;  %v791_v6 = vpop.f32.mrf.mxu3 }
 0x16f   : > { %v583_v7 = vadd.f32 %v582_v5, %v1648_v1  ;;  %v792_v8 = vadd.f32 %v791_v6, %v1650_v2 }
 0x171   : > { %932 = vst [vmem:[%s1656_s30 + $0x330] sm:$0xff] %v583_v7 }
 0x172   : > { %933 = vst [vmem:[%s1656_s30 + $0x338] sm:$0xff] %v792_v8  ;;  %v489_v9 = vpop.f32.mrf.mxu0  ;;  %v698_v10 = vpop.f32.mrf.mxu1 }
 0x173   : > { %v490_v11 = vadd.f32 %v489_v9, %v1648_v1  ;;  %v699_v12 = vadd.f32 %v698_v10, %v1650_v2 }
 0x175   : > { %870 = vst [vmem:[%s1656_s30 + $0x140] sm:$0xff] %v490_v11 }
 0x176   : > { %v585_v13 = vpop.f32.mrf.mxu2  ;;  %871 = vst [vmem:[%s1656_s30 + $0x148] sm:$0xff] %v699_v12  ;;  %v794_v14 = vpop.f32.mrf.mxu3 }
 0x177   : > { %v586_v15 = vadd.f32 %v585_v13, %v1648_v1  ;;  %v795_v16 = vadd.f32 %v794_v14, %v1650_v2 }
 0x179   : > { %934 = vst [vmem:[%s1656_s30 + $0x340] sm:$0xff] %v586_v15 }
 0x17a   : > { %935 = vst [vmem:[%s1656_s30 + $0x348] sm:$0xff] %v795_v16  ;;  %v492_v17 = vpop.f32.mrf.mxu0  ;;  %v701_v18 = vpop.f32.mrf.mxu1 }
 0x17b   : > { %v493_v19 = vadd.f32 %v492_v17, %v1648_v1  ;;  %v702_v20 = vadd.f32 %v701_v18, %v1650_v2 }
 0x17d   : > { %872 = vst [vmem:[%s1656_s30 + $0x150] sm:$0xff] %v493_v19 }
 0x17e   : > { %v588_v21 = vpop.f32.mrf.mxu2  ;;  %873 = vst [vmem:[%s1656_s30 + $0x158] sm:$0xff] %v702_v20  ;;  %v797_v22 = vpop.f32.mrf.mxu3 }
 0x17f   : > { %v589_v23 = vadd.f32 %v588_v21, %v1648_v1  ;;  %v798_v24 = vadd.f32 %v797_v22, %v1650_v2 }
 0x181   : > { %936 = vst [vmem:[%s1656_s30 + $0x350] sm:$0xff] %v589_v23 }
 0x182   : > { %937 = vst [vmem:[%s1656_s30 + $0x358] sm:$0xff] %v798_v24  ;;  %v495_v25 = vpop.f32.mrf.mxu0  ;;  %v704_v26 = vpop.f32.mrf.mxu1 }
 0x183   : > { %v496_v27 = vadd.f32 %v495_v25, %v1648_v1  ;;  %v705_v28 = vadd.f32 %v704_v26, %v1650_v2 }
 0x185   : > { %874 = vst [vmem:[%s1656_s30 + $0x160] sm:$0xff] %v496_v27 }
 0x186   : > { %v591_v29 = vpop.f32.mrf.mxu2  ;;  %875 = vst [vmem:[%s1656_s30 + $0x168] sm:$0xff] %v705_v28  ;;  %v800_v30 = vpop.f32.mrf.mxu3 }
 0x187   : > { %v592_v31 = vadd.f32 %v591_v29, %v1648_v1  ;;  %v801_v32 = vadd.f32 %v800_v30, %v1650_v2 }
 0x189   : > { %938 = vst [vmem:[%s1656_s30 + $0x360] sm:$0xff] %v592_v31 }
 0x18a   : > { %939 = vst [vmem:[%s1656_s30 + $0x368] sm:$0xff] %v801_v32  ;;  %v498_v33 = vpop.f32.mrf.mxu0  ;;  %v707_v34 = vpop.f32.mrf.mxu1 }
 0x18b   : > { %v499_v35 = vadd.f32 %v498_v33, %v1648_v1  ;;  %v708_v36 = vadd.f32 %v707_v34, %v1650_v2 }
 0x18d   : > { %876 = vst [vmem:[%s1656_s30 + $0x170] sm:$0xff] %v499_v35 }
 0x18e   : > { %v594_v37 = vpop.f32.mrf.mxu2  ;;  %877 = vst [vmem:[%s1656_s30 + $0x178] sm:$0xff] %v708_v36  ;;  %v803_v38 = vpop.f32.mrf.mxu3 }
 0x18f   : > { %v595_v39 = vadd.f32 %v594_v37, %v1648_v1  ;;  %v804_v40 = vadd.f32 %v803_v38, %v1650_v2 }
 0x191   : > { %940 = vst [vmem:[%s1656_s30 + $0x370] sm:$0xff] %v595_v39 }
 0x192   : > { %941 = vst [vmem:[%s1656_s30 + $0x378] sm:$0xff] %v804_v40  ;;  %v501_v41 = vpop.f32.mrf.mxu0  ;;  %v710_v42 = vpop.f32.mrf.mxu1 }
 0x193   : > { %v502_v43 = vadd.f32 %v501_v41, %v1648_v1  ;;  %v711_v44 = vadd.f32 %v710_v42, %v1650_v2 }
 0x195   : > { %878 = vst [vmem:[%s1656_s30 + $0x180] sm:$0xff] %v502_v43 }
 0x196   : > { %v597_v45 = vpop.f32.mrf.mxu2  ;;  %879 = vst [vmem:[%s1656_s30 + $0x188] sm:$0xff] %v711_v44  ;;  %v806_v46 = vpop.f32.mrf.mxu3 }
 0x197   : > { %v598_v47 = vadd.f32 %v597_v45, %v1648_v1  ;;  %v807_v48 = vadd.f32 %v806_v46, %v1650_v2 }
 0x199   : > { %942 = vst [vmem:[%s1656_s30 + $0x380] sm:$0xff] %v598_v47 }
 0x19a   : > { %943 = vst [vmem:[%s1656_s30 + $0x388] sm:$0xff] %v807_v48  ;;  %v504_v49 = vpop.f32.mrf.mxu0  ;;  %v713_v50 = vpop.f32.mrf.mxu1 }
 0x19b   : > { %v505_v51 = vadd.f32 %v504_v49, %v1648_v1  ;;  %v714_v52 = vadd.f32 %v713_v50, %v1650_v2 }
 0x19d   : > { %880 = vst [vmem:[%s1656_s30 + $0x190] sm:$0xff] %v505_v51 }
 0x19e   : > { %v600_v53 = vpop.f32.mrf.mxu2  ;;  %881 = vst [vmem:[%s1656_s30 + $0x198] sm:$0xff] %v714_v52  ;;  %v809_v54 = vpop.f32.mrf.mxu3 }
 0x19f   : > { %v601_v55 = vadd.f32 %v600_v53, %v1648_v1  ;;  %v810_v56 = vadd.f32 %v809_v54, %v1650_v2 }
 0x1a1   : > { %944 = vst [vmem:[%s1656_s30 + $0x390] sm:$0xff] %v601_v55 }
 0x1a2   : > { %945 = vst [vmem:[%s1656_s30 + $0x398] sm:$0xff] %v810_v56  ;;  %v507_v57 = vpop.f32.mrf.mxu0  ;;  %v716_v58 = vpop.f32.mrf.mxu1 }
 0x1a3   : > { %v508_v59 = vadd.f32 %v507_v57, %v1648_v1  ;;  %v717_v60 = vadd.f32 %v716_v58, %v1650_v2 }
 0x1a5   : > { %882 = vst [vmem:[%s1656_s30 + $0x1a0] sm:$0xff] %v508_v59 }
 0x1a6   : > { %v603_v61 = vpop.f32.mrf.mxu2  ;;  %883 = vst [vmem:[%s1656_s30 + $0x1a8] sm:$0xff] %v717_v60  ;;  %v812_v62 = vpop.f32.mrf.mxu3 }
 0x1a7   : > { %v604_v63 = vadd.f32 %v603_v61, %v1648_v1  ;;  %v813_v0 = vadd.f32 %v812_v62, %v1650_v2 }
 0x1a9   : > { %946 = vst [vmem:[%s1656_s30 + $0x3a0] sm:$0xff] %v604_v63 }
 0x1aa   : > { %947 = vst [vmem:[%s1656_s30 + $0x3a8] sm:$0xff] %v813_v0  ;;  %v510_v3 = vpop.f32.mrf.mxu0  ;;  %v719_v4 = vpop.f32.mrf.mxu1 }
 0x1ab   : > { %v511_v5 = vadd.f32 %v510_v3, %v1648_v1  ;;  %v720_v6 = vadd.f32 %v719_v4, %v1650_v2 }
 0x1ad   : > { %884 = vst [vmem:[%s1656_s30 + $0x1b0] sm:$0xff] %v511_v5 }
 0x1ae   : > { %v606_v7 = vpop.f32.mrf.mxu2  ;;  %885 = vst [vmem:[%s1656_s30 + $0x1b8] sm:$0xff] %v720_v6  ;;  %v815_v8 = vpop.f32.mrf.mxu3 }
 0x1af   : > { %v607_v9 = vadd.f32 %v606_v7, %v1648_v1  ;;  %v816_v10 = vadd.f32 %v815_v8, %v1650_v2 }
 0x1b1   : > { %948 = vst [vmem:[%s1656_s30 + $0x3b0] sm:$0xff] %v607_v9 }
 0x1b2   : > { %949 = vst [vmem:[%s1656_s30 + $0x3b8] sm:$0xff] %v816_v10  ;;  %v513_v11 = vpop.f32.mrf.mxu0  ;;  %v722_v12 = vpop.f32.mrf.mxu1 }
 0x1b3   : > { %v514_v13 = vadd.f32 %v513_v11, %v1648_v1  ;;  %v723_v14 = vadd.f32 %v722_v12, %v1650_v2 }
 0x1b5   : > { %886 = vst [vmem:[%s1656_s30 + $0x1c0] sm:$0xff] %v514_v13 }
 0x1b6   : > { %v609_v15 = vpop.f32.mrf.mxu2  ;;  %887 = vst [vmem:[%s1656_s30 + $0x1c8] sm:$0xff] %v723_v14  ;;  %v818_v16 = vpop.f32.mrf.mxu3 }
 0x1b7   : > { %v610_v17 = vadd.f32 %v609_v15, %v1648_v1  ;;  %v819_v18 = vadd.f32 %v818_v16, %v1650_v2 }
 0x1b9   : > { %950 = vst [vmem:[%s1656_s30 + $0x3c0] sm:$0xff] %v610_v17 }
 0x1ba   : > { %951 = vst [vmem:[%s1656_s30 + $0x3c8] sm:$0xff] %v819_v18  ;;  %v516_v19 = vpop.f32.mrf.mxu0  ;;  %v725_v20 = vpop.f32.mrf.mxu1 }
 0x1bb   : > { %v517_v21 = vadd.f32 %v516_v19, %v1648_v1  ;;  %v726_v22 = vadd.f32 %v725_v20, %v1650_v2 }
 0x1bd   : > { %888 = vst [vmem:[%s1656_s30 + $0x1d0] sm:$0xff] %v517_v21 }
 0x1be   : > { %v612_v23 = vpop.f32.mrf.mxu2  ;;  %889 = vst [vmem:[%s1656_s30 + $0x1d8] sm:$0xff] %v726_v22  ;;  %v821_v24 = vpop.f32.mrf.mxu3 }
 0x1bf   : > { %v613_v25 = vadd.f32 %v612_v23, %v1648_v1  ;;  %v822_v26 = vadd.f32 %v821_v24, %v1650_v2 }
 0x1c1   : > { %952 = vst [vmem:[%s1656_s30 + $0x3d0] sm:$0xff] %v613_v25 }
 0x1c2   : > { %953 = vst [vmem:[%s1656_s30 + $0x3d8] sm:$0xff] %v822_v26  ;;  %v519_v27 = vpop.f32.mrf.mxu0  ;;  %v728_v28 = vpop.f32.mrf.mxu1 }
 0x1c3   : > { %v520_v29 = vadd.f32 %v519_v27, %v1648_v1  ;;  %v729_v30 = vadd.f32 %v728_v28, %v1650_v2 }
 0x1c5   : > { %890 = vst [vmem:[%s1656_s30 + $0x1e0] sm:$0xff] %v520_v29 }
 0x1c6   : > { %v615_v31 = vpop.f32.mrf.mxu2  ;;  %891 = vst [vmem:[%s1656_s30 + $0x1e8] sm:$0xff] %v729_v30  ;;  %v824_v32 = vpop.f32.mrf.mxu3 }
 0x1c7   : > { %v616_v33 = vadd.f32 %v615_v31, %v1648_v1  ;;  %v825_v34 = vadd.f32 %v824_v32, %v1650_v2 }
 0x1c9   : > { %954 = vst [vmem:[%s1656_s30 + $0x3e0] sm:$0xff] %v616_v33 }
 0x1ca   : > { %955 = vst [vmem:[%s1656_s30 + $0x3e8] sm:$0xff] %v825_v34  ;;  %v522_v35 = vpop.f32.mrf.mxu0  ;;  %v731_v36 = vpop.f32.mrf.mxu1 }
 0x1cb   : > { %v523_v37 = vadd.f32 %v522_v35, %v1648_v1  ;;  %v732_v38 = vadd.f32 %v731_v36, %v1650_v2 }
 0x1cd   : > { %892 = vst [vmem:[%s1656_s30 + $0x1f0] sm:$0xff] %v523_v37 }
 0x1ce   : > { %v618_v39 = vpop.f32.mrf.mxu2  ;;  %893 = vst [vmem:[%s1656_s30 + $0x1f8] sm:$0xff] %v732_v38  ;;  %v827_v40 = vpop.f32.mrf.mxu3 }
 0x1cf   : > { %v619_v41 = vadd.f32 %v618_v39, %v1648_v1  ;;  %v828_v42 = vadd.f32 %v827_v40, %v1650_v2 }
 0x1d1   : > { %956 = vst [vmem:[%s1656_s30 + $0x3f0] sm:$0xff] %v619_v41 }
 0x1d2   : > { %957 = vst [vmem:[%s1656_s30 + $0x3f8] sm:$0xff] %v828_v42 }
 0x1d3   : > { %1367 = shalt.err (!%p1364_p13)
}
 0x1d4   : > { %s1432_s4 = smov 256   ;;  %s1433_s28 = smov 512  }
 0x1d5   : > { %s1434_s14 = smov 16  }
 0x1d6   : > { %1177 = dma.vmem_to_hbm [thread:$0]  (%p1510_p9), %s976_s15, 16384, %s978_s8, %s959_s29, %s1432_s4, %s1433_s28, %s1434_s14  }
 0x1d7 PF: > { %s2005_s12 = sld [smem:[#allocation12_spill]]  ;;  %p1190_p0 = pnand %p1119_p12, %p1517_p11 }
 0x1d8   : > { %s2007_s20 = sld [smem:[#allocation14_spill]] }
 0x1d9   : > { %p1191_p1 = pneg %p1190_p0 }
 0x1dd   : > { %s992_s26 = sand.u32 1, %s2005_s12  }
 0x1de   : > { %s993_s18 = scalar_lea.sflag [#allocation4], %s992_s26 }
 0x1df   : > { %1401 = dma.done.wait (%p1191_p1), %s993_s18, 16384  }
 0x1e0   : > { %1403 = vsyncadd (%p1191_p1), %s993_s18, 4294950912  ;;  %s22_s17 = sadd.s32 1, %s2007_s20   ;;  %s2008_s24 = sld [smem:[#allocation13_spill]] }
 0x1e1   : > { %p19_p2 = scmp.ge.s32.totalorder %s22_s17, 4   ;;  %s2009_s14 = sld [smem:[#allocation16_spill]] }
 0x1e2   : > { %s2010_s25 = sld [smem:[#allocation15_spill]]  ;;  %s2011_s12 = smov %s1410_s13 }
 0x1e3   : > { %s2013_s15 = smov %s1422_s16 }
 0x1e4   :  { %21 = sbr.rel (!%p19_p2) target bundleno = 10 (0xa), region = 101 }
 0x1e6   : > { %s2012_s13 = smov %s2008_s24 }
 0x1e8   : > { %s2014_s16 = smov %s2010_s25 }
 0x1e9   :  { %999 = vsyncpa [#allocation3], 1 }
 0x1ea   :  { %1001 = vsyncpa [#allocation3 + $0x1], 1 }
 0x1eb   :  { %1002 = vsyncpa [#allocation6], 1 }
 0x1ec   :  { %1004 = vsyncpa [#allocation6 + $0x1], 1 }
 0x1ed   :  { %1005 = vsyncpa [#allocation4], 1 }
 0x1ee   :  { %1007 = vsyncpa [#allocation4 + $0x1], 1 }

</bundles_post_ra>
